<compile_context>
chip_gen: v7x
topology: tpu7x:2x2x1
jax: 0.10.0
libtpu: 0.0.40
codegen_flags: <defaults>
</compile_context>

<pallas_src>
import jax
import jax.numpy as jnp
from jax import lax
from jax.experimental import pallas as pl
from jax.experimental.pallas import tpu as pltpu


def _round_up(n: int, m: int) -> int:
    return ((n + m - 1) // m) * m


def _inverse_decoder_kernel(x_ref, w1_ref, b1_ref, w2_ref, b2_ref, o_ref):
    """One batch tile: logit -> Linear1 -> atanh -> Linear2.

    x_ref : (TB, D_in_p)   f32   streamed per grid step
    w1_ref: (H1_p, D_in_p) bf16  resident (PyTorch (out, in) layout, no transpose)
    b1_ref: (1, H1_p)      f32   resident
    w2_ref: (D_out_p, H1_p) bf16 resident
    b2_ref: (1, D_out_p)   f32   resident
    o_ref : (TB, D_out_p)  f32   lane-dense output tile
    """
    # ---- SigmoidInverse: clamp(x, 0.001, 0.999); logit(x) = log(x / (1 - x)).
    # Single log + exact reciprocal per element (instead of two logs).
    x = jnp.clip(x_ref[...], 0.001, 0.999)
    x = jnp.log(x * pl.reciprocal(1.0 - x, approx=False))

    # ---- Linear 1: contract on in_features (MXU, bf16 operands, f32 accum).
    h = lax.dot_general(
        x.astype(jnp.bfloat16), w1_ref[...],
        dimension_numbers=(((1,), (1,)), ((), ())),
        preferred_element_type=jnp.float32)
    h = h + b1_ref[...]                      # (1, H1_p) broadcasts over batch

    # ---- TanhInverse: clamp(h, -0.999, 0.999); atanh(h) = 0.5*log((1+h)/(1-h)).
    h = jnp.clip(h, -0.999, 0.999)
    h = 0.5 * jnp.log((1.0 + h) * pl.reciprocal(1.0 - h, approx=False))

    # ---- Linear 2 (the trailing TanhInverse is dropped by `[:-1]` in torch).
    o = lax.dot_general(
        h.astype(jnp.bfloat16), w2_ref[...],
        dimension_numbers=(((1,), (1,)), ((), ())),
        preferred_element_type=jnp.float32)
    o_ref[...] = (o + b2_ref[...]).astype(o_ref.dtype)


def inverse_decoder_forward(x, w1, b1, w2, b2, *, max_tile_rows=512):
    """JAX/Pallas equivalent of InverseDecoderModel.forward.

    x  : (N, C, H, W) float32  (flattened per-sample, as in the torch module)
    w1 : (H1, D_in)   float32  -- first encoder weight (PyTorch (out, in) layout)
    b1 : (H1,)        float32
    w2 : (D_out, H1)  float32
    b2 : (D_out,)     float32
    """
    B = x.shape[0]
    xf = x.reshape(B, -1).astype(jnp.float32)
    d_in = xf.shape[1]
    h1, d_in_w = w1.shape
    d_out, h1_w = w2.shape
    assert d_in_w == d_in and h1_w == h1

    # Lane-dense / MXU-aligned padded dims (multiples of 128).
    d_in_p = _round_up(d_in, 128)
    h1_p = _round_up(h1, 128)
    d_out_p = _round_up(d_out, 128)

    # Batch tile: multiple of 8 sublanes, sized against a conservative VMEM
    # budget (double-buffered x/out tiles + resident bf16 weights + the h
    # intermediate), so the kernel fits scoped VMEM on v5e/v6e and v7x (64 MiB).
    vmem_budget = 20 << 20
    weight_bytes = (h1_p * d_in_p + d_out_p * h1_p) * 2 + (h1_p + d_out_p) * 4
    per_row_bytes = 2 * (d_in_p + d_out_p) * 4 + h1_p * 4
    rows_fit = max(8, (vmem_budget - weight_bytes) // max(per_row_bytes, 1))
    tb = min(max_tile_rows, _round_up(B, 8), (rows_fit // 8) * 8)
    tb = max(tb, 8)
    b_p = _round_up(B, tb)

    # Zero-pad params (padded rows/cols contribute exactly zero to the result);
    # pad x with a harmless in-range constant. In a real training/serving loop
    # these padded bf16 weights would be prepared once outside the step.
    x_p = jnp.pad(xf, ((0, b_p - B), (0, d_in_p - d_in)), constant_values=0.5)
    w1_p = jnp.pad(jnp.asarray(w1, jnp.float32),
                   ((0, h1_p - h1), (0, d_in_p - d_in))).astype(jnp.bfloat16)
    w2_p = jnp.pad(jnp.asarray(w2, jnp.float32),
                   ((0, d_out_p - d_out), (0, h1_p - h1))).astype(jnp.bfloat16)
    b1_p = jnp.pad(jnp.asarray(b1, jnp.float32), (0, h1_p - h1)).reshape(1, h1_p)
    b2_p = jnp.pad(jnp.asarray(b2, jnp.float32),
                   (0, d_out_p - d_out)).reshape(1, d_out_p)

    grid = (b_p // tb,)
    cost = pl.CostEstimate(
        flops=2 * b_p * (d_in_p * h1_p + h1_p * d_out_p),
        transcendentals=2 * b_p * (d_in_p + h1_p),
        bytes_accessed=(x_p.size * 4 + w1_p.size * 2 + w2_p.size * 2
                        + b1_p.size * 4 + b2_p.size * 4 + b_p * d_out_p * 4),
    )

    out = pl.pallas_call(
        _inverse_decoder_kernel,
        out_shape=jax.ShapeDtypeStruct((b_p, d_out_p), jnp.float32),
        grid=grid,
        in_specs=[
            pl.BlockSpec((tb, d_in_p), lambda i: (i, 0)),      # x: streamed
            pl.BlockSpec((h1_p, d_in_p), lambda i: (0, 0)),    # w1: resident
            pl.BlockSpec((1, h1_p), lambda i: (0, 0)),         # b1: resident
            pl.BlockSpec((d_out_p, h1_p), lambda i: (0, 0)),   # w2: resident
            pl.BlockSpec((1, d_out_p), lambda i: (0, 0)),      # b2: resident
        ],
        out_specs=pl.BlockSpec((tb, d_out_p), lambda i: (i, 0)),
        compiler_params=pltpu.CompilerParams(
            dimension_semantics=("parallel",),        # megacore on v7x
            vmem_limit_bytes=32 * 1024 * 1024),
        cost_estimate=cost,
    )(x_p, w1_p, b1_p, w2_p, b2_p)

    return out[:B, :d_out]


def _reference_f32(x, w1, b1, w2, b2):
    """Pure-JAX f32 reference matching the PyTorch forward exactly."""
    xf = x.reshape(x.shape[0], -1)
    xf = jnp.clip(xf, 0.001, 0.999)
    xf = jnp.log(xf / (1.0 - xf))                 # torch.logit
    h = xf @ w1.T + b1                            # nn.Linear
    h = jnp.clip(h, -0.999, 0.999)
    h = jnp.arctanh(h)                            # torch.atanh
    return h @ w2.T + b2                          # last Linear (final atanh dropped)


def _reference_mixed(x, w1, b1, w2, b2):
    """Same math with bf16 MXU operands / f32 accumulation (kernel's precision)."""
    xf = x.reshape(x.shape[0], -1)
    xf = jnp.clip(xf, 0.001, 0.999)
    xf = jnp.log(xf / (1.0 - xf))
    h = jnp.dot(xf.astype(jnp.bfloat16), w1.T.astype(jnp.bfloat16),
                preferred_element_type=jnp.float32) + b1
    h = jnp.clip(h, -0.999, 0.999)
    h = jnp.arctanh(h)
    return jnp.dot(h.astype(jnp.bfloat16), w2.T.astype(jnp.bfloat16),
                   preferred_element_type=jnp.float32) + b2


if __name__ == "__main__":
    key = jax.random.PRNGKey(0)
    k_x, k_w1, k_b1, k_w2, k_b2 = jax.random.split(key, 5)

    # Small shapes consistent with the module:
    #   x: (N=2, C=4, H=4, W=2) -> per-sample D_in = 32
    #   encoder: fc1 (64, 32) + bias, fc2 (16, 64) + bias
    N, C, H, W = 2, 4, 4, 2
    D_in, H1, D_out = C * H * W, 64, 16

    # Inputs in (0,1), like sigmoid outputs (the model inverts a sigmoid first).
    x = jax.random.uniform(k_x, (N, C, H, W), jnp.float32, minval=0.0, maxval=1.0)
    w1 = jax.random.normal(k_w1, (H1, D_in), jnp.float32) * 0.01
    b1 = jax.random.normal(k_b1, (H1,), jnp.float32) * 0.01
    w2 = jax.random.normal(k_w2, (D_out, H1), jnp.float32) * 0.05
    b2 = jax.random.normal(k_b2, (D_out,), jnp.float32) * 0.05

    y = jax.block_until_ready(inverse_decoder_forward(x, w1, b1, w2, b2))
    assert y.shape == (N, D_out), y.shape

    y_mixed = _reference_mixed(x, w1, b1, w2, b2)   # kernel precision (bf16 MXU)
    y_f32 = _reference_f32(x, w1, b1, w2, b2)       # exact torch-equivalent math
    err_mixed = float(jnp.max(jnp.abs(y - y_mixed)))
    err_f32 = float(jnp.max(jnp.abs(y - y_f32)))
    assert jnp.allclose(y, y_mixed, atol=2e-3, rtol=2e-3), err_mixed
    assert jnp.allclose(y, y_f32, atol=1e-2, rtol=1e-2), err_f32

    print("KERNEL_OK")
</pallas_src>

<mosaic_0001>
module attributes {stable_mosaic.version = 11 : i64} {
  func.func @_inverse_decoder_kernel(%arg0: i32, %arg1: memref<8x128xf32, #tpu.memory_space<vmem>>, %arg2: memref<128x128xbf16, #tpu.memory_space<vmem>>, %arg3: memref<1x128xf32, #tpu.memory_space<vmem>>, %arg4: memref<128x128xbf16, #tpu.memory_space<vmem>>, %arg5: memref<1x128xf32, #tpu.memory_space<vmem>>, %arg6: memref<8x128xf32, #tpu.memory_space<vmem>>) attributes {dimension_semantics = [#tpu.dimension_semantics<parallel>], iteration_bounds = array<i64: 1>, scalar_prefetch = 0 : i64, scratch_operands = 0 : i64, tpu.core_type = #tpu.core_type<tc>, window_params = [{transform_indices = @transform_0, window_bounds = array<i64: 8, 128>}, {pipeline_mode = #tpu.pipeline_mode<synchronous>, transform_indices = @transform_1, window_bounds = array<i64: 128, 128>}, {pipeline_mode = #tpu.pipeline_mode<synchronous>, transform_indices = @transform_2, window_bounds = array<i64: 1, 128>}, {pipeline_mode = #tpu.pipeline_mode<synchronous>, transform_indices = @transform_3, window_bounds = array<i64: 128, 128>}, {pipeline_mode = #tpu.pipeline_mode<synchronous>, transform_indices = @transform_4, window_bounds = array<i64: 1, 128>}, {transform_indices = @transform_5, window_bounds = array<i64: 8, 128>}]} {
    %c0 = arith.constant 0 : index
    %c0_0 = arith.constant 0 : index
    %0 = vector.load %arg1[%c0, %c0_0] : memref<8x128xf32, #tpu.memory_space<vmem>>, vector<8x128xf32>
    %cst = arith.constant 1.000000e-03 : f32
    %cst_1 = arith.constant 9.990000e-01 : f32
    %1 = vector.broadcast %cst : f32 to vector<8x128xf32>
    %2 = arith.maximumf %1, %0 : vector<8x128xf32>
    %3 = vector.broadcast %cst_1 : f32 to vector<8x128xf32>
    %4 = arith.minimumf %3, %2 : vector<8x128xf32>
    %cst_2 = arith.constant 1.000000e+00 : f32
    %5 = vector.broadcast %cst_2 : f32 to vector<8x128xf32>
    %6 = arith.subf %5, %4 : vector<8x128xf32>
    %7 = tpu.reciprocal %6 : vector<8x128xf32> -> vector<8x128xf32>
    %8 = arith.mulf %4, %7 : vector<8x128xf32>
    %9 = math.log %8 : vector<8x128xf32>
    %10 = arith.truncf %9 : vector<8x128xf32> to vector<8x128xbf16>
    %c0_3 = arith.constant 0 : index
    %c0_4 = arith.constant 0 : index
    %11 = vector.load %arg2[%c0_3, %c0_4] : memref<128x128xbf16, #tpu.memory_space<vmem>>, vector<128x128xbf16>
    %cst_5 = arith.constant dense<0.000000e+00> : vector<8x128xf32>
    %12 = tpu.matmul %10, %11, %cst_5 {dimension_numbers = #tpu.dot_dimension_numbers<[1], [1], [0], [0], [0, 0, 1, 0], [], []>} : vector<8x128xbf16>, vector<128x128xbf16>, vector<8x128xf32> -> vector<8x128xf32>
    %c0_6 = arith.constant 0 : index
    %c0_7 = arith.constant 0 : index
    %13 = vector.load %arg3[%c0_6, %c0_7] : memref<1x128xf32, #tpu.memory_space<vmem>>, vector<1x128xf32>
    %14 = vector.broadcast %13 : vector<1x128xf32> to vector<8x128xf32>
    %15 = arith.addf %12, %14 : vector<8x128xf32>
    %cst_8 = arith.constant -9.990000e-01 : f32
    %cst_9 = arith.constant 9.990000e-01 : f32
    %16 = vector.broadcast %cst_8 : f32 to vector<8x128xf32>
    %17 = arith.maximumf %16, %15 : vector<8x128xf32>
    %18 = vector.broadcast %cst_9 : f32 to vector<8x128xf32>
    %19 = arith.minimumf %18, %17 : vector<8x128xf32>
    %cst_10 = arith.constant 1.000000e+00 : f32
    %20 = vector.broadcast %cst_10 : f32 to vector<8x128xf32>
    %21 = arith.addf %20, %19 : vector<8x128xf32>
    %cst_11 = arith.constant 1.000000e+00 : f32
    %22 = vector.broadcast %cst_11 : f32 to vector<8x128xf32>
    %23 = arith.subf %22, %19 : vector<8x128xf32>
    %24 = tpu.reciprocal %23 : vector<8x128xf32> -> vector<8x128xf32>
    %25 = arith.mulf %21, %24 : vector<8x128xf32>
    %26 = math.log %25 : vector<8x128xf32>
    %cst_12 = arith.constant 5.000000e-01 : f32
    %27 = vector.broadcast %cst_12 : f32 to vector<8x128xf32>
    %28 = arith.mulf %27, %26 : vector<8x128xf32>
    %29 = arith.truncf %28 : vector<8x128xf32> to vector<8x128xbf16>
    %c0_13 = arith.constant 0 : index
    %c0_14 = arith.constant 0 : index
    %30 = vector.load %arg4[%c0_13, %c0_14] : memref<128x128xbf16, #tpu.memory_space<vmem>>, vector<128x128xbf16>
    %cst_15 = arith.constant dense<0.000000e+00> : vector<8x128xf32>
    %31 = tpu.matmul %29, %30, %cst_15 {dimension_numbers = #tpu.dot_dimension_numbers<[1], [1], [0], [0], [0, 0, 1, 0], [], []>} : vector<8x128xbf16>, vector<128x128xbf16>, vector<8x128xf32> -> vector<8x128xf32>
    %c0_16 = arith.constant 0 : index
    %c0_17 = arith.constant 0 : index
    %32 = vector.load %arg5[%c0_16, %c0_17] : memref<1x128xf32, #tpu.memory_space<vmem>>, vector<1x128xf32>
    %33 = vector.broadcast %32 : vector<1x128xf32> to vector<8x128xf32>
    %34 = arith.addf %31, %33 : vector<8x128xf32>
    %c0_18 = arith.constant 0 : index
    %c0_19 = arith.constant 0 : index
    %35 = vector.load %arg6[%c0_18, %c0_19] : memref<8x128xf32, #tpu.memory_space<vmem>>, vector<8x128xf32>
    tpu.vector_store %arg6[%c0_18, %c0_19], %34 {strides = array<i32>} : memref<8x128xf32, #tpu.memory_space<vmem>>, vector<8x128xf32>,
    return
  }
  func.func @transform_0(%arg0: i32) -> (i32, i32) {
    %c0_i32 = arith.constant 0 : i32
    %c0_i32_0 = arith.constant 0 : i32
    return %arg0, %c0_i32 : i32, i32
  }
  func.func @transform_1(%arg0: i32) -> (i32, i32) {
    %c0_i32 = arith.constant 0 : i32
    %c0_i32_0 = arith.constant 0 : i32
    %c0_i32_1 = arith.constant 0 : i32
    return %c0_i32, %c0_i32_0 : i32, i32
  }
  func.func @transform_2(%arg0: i32) -> (i32, i32) {
    %c0_i32 = arith.constant 0 : i32
    %c0_i32_0 = arith.constant 0 : i32
    %c0_i32_1 = arith.constant 0 : i32
    return %c0_i32, %c0_i32_0 : i32, i32
  }
  func.func @transform_3(%arg0: i32) -> (i32, i32) {
    %c0_i32 = arith.constant 0 : i32
    %c0_i32_0 = arith.constant 0 : i32
    %c0_i32_1 = arith.constant 0 : i32
    return %c0_i32, %c0_i32_0 : i32, i32
  }
  func.func @transform_4(%arg0: i32) -> (i32, i32) {
    %c0_i32 = arith.constant 0 : i32
    %c0_i32_0 = arith.constant 0 : i32
    %c0_i32_1 = arith.constant 0 : i32
    return %c0_i32, %c0_i32_0 : i32, i32
  }
  func.func @transform_5(%arg0: i32) -> (i32, i32) {
    %c0_i32 = arith.constant 0 : i32
    %c0_i32_0 = arith.constant 0 : i32
    return %arg0, %c0_i32 : i32, i32
  }
}

</mosaic_0001>

<bundles_post_ra>
// kernel: tpu_custom_call.1
= control target key start
LH: loop header
LB: loop body
LE: loop exit
PB: predicated region body
PF: predicated region fallthrough
CT: control target
= control target key end

     0   :  { %10 = vsyncpa [#allocation3], 0  ;;  %s620_s0 = inlined_call_operand.hbm [shape: f32[8,128], index: 0, kind: input, shape index: {}]   ;;  %s621_s1 = inlined_call_operand.hbm [shape: bf16[128,128], index: 1, kind: input, shape index: {}]   ;;  %s622_s2 = inlined_call_operand.vmem [shape: f32[1,128], index: 2, kind: input, shape index: {}]   ;;  %s623_s3 = inlined_call_operand.hbm [shape: bf16[128,128], index: 3, kind: input, shape index: {}]   ;;  %s624_s4 = inlined_call_operand.vmem [shape: f32[1,128], index: 4, kind: input, shape index: {}]   ;;  %s625_s5 = inlined_call_operand.hbm [shape: f32[8,128], index: 5, kind: output, shape index: {}]  }
   0x1   :  { %11 = vsyncpa [#allocation6], 0 }
   0x2   :  { %12 = vsyncpa [#allocation4], 0  ;;  %s522_s18 = smov [#allocation5]   ;;  %s428_s22 = scalar_lea.hbm %s621_s1, 1024 }
   0x3   :  { %s28_s19 = sshll.u32 %s522_s18, 4  ;;  %p429_p0 = scmp.ne.s32.totalorder %s621_s1, %s428_s22  ;;  %s29_s19 = int_to_ptr.vmem [resolvable:$true] %s28_s19 }
   0x4   :  { %p432_p1 = scmp.lt.u32.totalorder %s428_s22, %s621_s1 }
   0x6   :  { %p434_p2 = pnand %p432_p1, %p429_p0 }
   0x8   :  { %437 = shalt.err (!%p434_p2)
}
   0x9   :  { %s438_s27 = scalar_lea.vmem %s29_s19, 1024  ;;  %p443_p4 = scmp.lt.s32.totalorder %s29_s19, %s29_s19 }
   0xa   :  { %p439_p3 = scmp.ne.s32.totalorder %s29_s19, %s438_s27  ;;  %p444_p5 = scmp.lt.s32.totalorder %s438_s27, %s438_s27 }
   0xc   :  { %p445_p6 = por %p444_p5, %p443_p4 }
   0xe   :  { %p446_p7 = pnand %p445_p6, %p439_p3 }
  0x10   :  { %449 = shalt.err (!%p446_p7)
}
  0x11   :  { %s523_s28 = smov 64   ;;  %s524_s29 = smov 4  }
  0x12   :  { %34 = dma.hbm_to_vmem [thread:$0]  %s621_s1, 1024, %s29_s19, [#allocation6], %s523_s28, %s523_s28, %s524_s29  }
  0x13   :  { %s525_s7 = smov [#allocation2]   ;;  %s526_s9 = smov [#allocation7]  }
  0x14   :  { %s19_s8 = sshll.u32 %s525_s7, 4  ;;  %s42_s10 = sshll.u32 %s526_s9, 4  ;;  %s20_s8 = int_to_ptr.vmem [resolvable:$true] %s19_s8  ;;  %s43_s10 = int_to_ptr.vmem [resolvable:$true] %s42_s10 }
  0x15   :  { %s450_s13 = scalar_lea.hbm %s620_s0, 128 }
  0x16   :  { %p451_p8 = scmp.ne.s32.totalorder %s620_s0, %s450_s13  ;;  %p454_p9 = scmp.lt.u32.totalorder %s450_s13, %s620_s0 }
  0x18   :  { %p456_p10 = pnand %p454_p9, %p451_p8 }
  0x1a   :  { %459 = shalt.err (!%p456_p10)
}
  0x1b   :  { %s460_s1 = scalar_lea.vmem %s20_s8, 128  ;;  %p465_p12 = scmp.lt.s32.totalorder %s20_s8, %s20_s8 }
  0x1c   :  { %p461_p11 = scmp.ne.s32.totalorder %s20_s8, %s460_s1  ;;  %p466_p13 = scmp.lt.s32.totalorder %s460_s1, %s460_s1 }
  0x1e   :  { %p467_p0 = por %p466_p13, %p465_p12 }
  0x20   :  { %p468_p1 = pnand %p467_p0, %p461_p11 }
  0x22   :  { %471 = shalt.err (!%p468_p1)
}
  0x23   :  { %22 = dma.hbm_to_vmem [thread:$0]  %s620_s0, 128, %s20_s8, [#allocation3]  }
  0x24   :  { %s472_s22 = scalar_lea.hbm %s623_s3, 1024 }
  0x25   :  { %p473_p2 = scmp.ne.s32.totalorder %s623_s3, %s472_s22  ;;  %p476_p3 = scmp.lt.u32.totalorder %s472_s22, %s623_s3 }
  0x27   :  { %p478_p4 = pnand %p476_p3, %p473_p2 }
  0x29   :  { %481 = shalt.err (!%p478_p4)
}
  0x2a   :  { %s482_s27 = scalar_lea.vmem %s43_s10, 1024  ;;  %p487_p6 = scmp.lt.s32.totalorder %s43_s10, %s43_s10 }
  0x2b   :  { %p483_p5 = scmp.ne.s32.totalorder %s43_s10, %s482_s27  ;;  %p488_p7 = scmp.lt.s32.totalorder %s482_s27, %s482_s27 }
  0x2d   :  { %p489_p8 = por %p488_p7, %p487_p6 }
  0x2f   :  { %p490_p9 = pnand %p489_p8, %p483_p5 }
  0x31   :  { %493 = shalt.err (!%p490_p9)
}
  0x32   :  { %48 = dma.hbm_to_vmem [thread:$0]  %s623_s3, 1024, %s43_s10, [#allocation6], %s523_s28, %s523_s28, %s524_s29  }
  0x33   :  { %516 = dma.done.wait [#allocation3], 128  }
  0x34   :  { %517 = vsyncadd [#allocation3], 4294967168 }
  0x35   :  { %518 = dma.done.wait [#allocation6], 2048  }
  0x36   :  { %519 = vsyncadd [#allocation6], 4294965248  ;;  %v527_v0 = vmov 0.0   ;;  %vm528_vm0 = vmmov 0   ;;  %v404_v1 = vld [vmem:[#allocation5] sm:$0xff]   ;;  %v405_v2 = vld [vmem:[#allocation5 + $0x8] sm:$0xff]  }
  0x37   :  { %356 = vmatprep.subr.bf16.mxu0 %v527_v0  ;;  %372 = vmatprep.mubr.msk.bf16.mxu0 %vm528_vm0, %v527_v0  ;;  %v61_v3 = vld [vmem:[#allocation2] sm:$0xff]  ;;  %v412_v4 = vld [vmem:[#allocation7] sm:$0xff]   ;;  %v406_v5 = vld [vmem:[#allocation5 + $0x10] sm:$0xff]  }
  0x38   :  { %376 = vmatprep.subr.bf16.mxu1 %v527_v0  ;;  %392 = vmatprep.mubr.msk.bf16.mxu1 %vm528_vm0, %v527_v0  ;;  %v62_v6 = vmax.f32 %v61_v3, 0.001  ;;  %v413_v7 = vld [vmem:[#allocation7 + $0x8] sm:$0xff]   ;;  %v407_v9 = vld [vmem:[#allocation5 + $0x18] sm:$0xff]   ;;  %v414_v11 = vld [vmem:[#allocation7 + $0x10] sm:$0xff]  }
  0x39   :  { %357 = vmatpush3.bf16.xpose.msra.mxu0 %v404_v1  ;;  %377 = vmatpush3.bf16.xpose.msra.mxu1 %v412_v4  ;;  %v408_v12 = vld [vmem:[#allocation5 + $0x20] sm:$0xff]   ;;  %v415_v13 = vld [vmem:[#allocation7 + $0x18] sm:$0xff]   ;;  %v409_v15 = vld [vmem:[#allocation5 + $0x28] sm:$0xff]  }
  0x3a   :  { %358 = vmatprep.subr.bf16.mxu0 %v527_v0  ;;  %378 = vmatprep.subr.bf16.mxu1 %v527_v0  ;;  %v63_v8 = vmin.f32 %v62_v6, 0.999  ;;  %v410_v17 = vld [vmem:[#allocation5 + $0x30] sm:$0xff]   ;;  %v411_v19 = vld [vmem:[#allocation5 + $0x38] sm:$0xff]   ;;  %v416_v22 = vld [vmem:[#allocation7 + $0x20] sm:$0xff]  }
  0x3b   :  { %v417_v23 = vld [vmem:[#allocation7 + $0x28] sm:$0xff]   ;;  %v418_v24 = vld [vmem:[#allocation7 + $0x30] sm:$0xff]   ;;  %v419_v25 = vld [vmem:[#allocation7 + $0x38] sm:$0xff]  }
  0x3c   :  { %v64_v10 = vsub.f32 1.0, %v63_v8  ;;  %v319_v26 = vld [vmem:[%s622_s2] ss:$0 sm:$0xff]  ;;  %s529_s2 = smov [#allocation8]  }
  0x3d   :  { %v329_v41 = vld [vmem:[%s624_s4] ss:$0 sm:$0xff]  ;;  %s309_s7 = sshll.u32 %s529_s2, 4  ;;  %s310_s7 = int_to_ptr.vmem [resolvable:$true] %s309_s7 }
  0x3e   :  { %420 = vrcp.f32 %v64_v10  ;;  %s494_s8 = scalar_lea.vmem %s310_s7, 128  ;;  %p499_p11 = scmp.lt.s32.totalorder %s310_s7, %s310_s7 }
  0x3f   :  { %p495_p10 = scmp.ne.s32.totalorder %s310_s7, %s494_s8  ;;  %p500_p12 = scmp.lt.s32.totalorder %s494_s8, %s494_s8 }
  0x41   :  { %359 = vmatpush3.bf16.xpose.msra.mxu0 %v405_v2  ;;  %379 = vmatpush3.bf16.xpose.msra.mxu1 %v413_v7  ;;  %p501_p13 = por %p500_p12, %p499_p11 }
  0x42   :  { %360 = vmatprep.subr.bf16.mxu0 %v527_v0  ;;  %380 = vmatprep.subr.bf16.mxu1 %v527_v0 }
  0x43   :  { %p502_p0 = pnand %p501_p13, %p495_p10 }
  0x48   :  { %v421_v14 = vpop.eup %420 }
  0x49   :  { %361 = vmatpush3.bf16.xpose.msra.mxu0 %v406_v5  ;;  %381 = vmatpush3.bf16.xpose.msra.mxu1 %v414_v11  ;;  %v66_v16 = vmul.f32 %v421_v14, %v63_v8 }
  0x4a   :  { %362 = vmatprep.subr.bf16.mxu0 %v527_v0  ;;  %382 = vmatprep.subr.bf16.mxu1 %v527_v0 }
  0x4b   :  { %422 = vlog2.f32 %v66_v16 }
  0x51   :  { %363 = vmatpush3.bf16.xpose.msra.mxu0 %v407_v9  ;;  %383 = vmatpush3.bf16.xpose.msra.mxu1 %v415_v13 }
  0x52   :  { %364 = vmatprep.subr.bf16.mxu0 %v527_v0  ;;  %384 = vmatprep.subr.bf16.mxu1 %v527_v0 }
  0x55   :  { %v423_v18 = vpop.eup %422 }
  0x56   :  { %v68_v20 = vmul.f32 0.6931472, %v423_v18 }
  0x58   :  { %v69_v21 = vpack.c.bf16 %v68_v20, %v68_v20 }
  0x59   :  { %365 = vmatpush3.bf16.xpose.msra.mxu0 %v408_v12  ;;  %385 = vmatpush3.bf16.xpose.msra.mxu1 %v416_v22 }
  0x5a   :  { %366 = vmatprep.subr.bf16.mxu0 %v527_v0  ;;  %386 = vmatprep.subr.bf16.mxu1 %v527_v0 }
  0x61   :  { %367 = vmatpush3.bf16.xpose.msra.mxu0 %v409_v15  ;;  %387 = vmatpush3.bf16.xpose.msra.mxu1 %v417_v23 }
  0x62   :  { %368 = vmatprep.subr.bf16.mxu0 %v527_v0  ;;  %388 = vmatprep.subr.bf16.mxu1 %v527_v0 }
  0x69   :  { %369 = vmatpush3.bf16.xpose.msra.mxu0 %v410_v17  ;;  %389 = vmatpush3.bf16.xpose.msra.mxu1 %v418_v24 }
  0x6a   :  { %370 = vmatprep.subr.bf16.mxu0 %v527_v0  ;;  %390 = vmatprep.subr.bf16.mxu1 %v527_v0 }
  0x71   :  { %371 = vmatpush3.bf16.xpose.msra.mxu0 %v411_v19  ;;  %391 = vmatpush3.bf16.xpose.msra.mxu1 %v419_v25 }
  0x78   :  { %373 = vmatmul.mubr.bf16.vlgmr.msra.gmra.mrb[0].mxu0 %v69_v21 }
 0x14b   :  { %v175_v27 = vpop.f32.mrb[0].mxu0 }
 0x14c   :  { %v176_v28 = vadd.f32 %v319_v26, %v175_v27  ;;  %v374_v29 = vpop.f32.mrb[1].mxu0 }
 0x14d   :  { %v178_v30 = vpop.f32.mrb[2].mxu0 }
 0x14e   :  { %v328_v31 = vclamps-f32 %v176_v28, 0.999  ;;  %v375_v32 = vpop.f32.mrb[3].mxu0 }
 0x150   :  { %v184_v33 = vsub.f32 1.0, %v328_v31  ;;  %v183_v34 = vadd.f32 1.0, %v328_v31 }
 0x152   :  { %424 = vrcp.f32 %v184_v33 }
 0x15c   :  { %v425_v35 = vpop.eup %424 }
 0x15d   :  { %v186_v36 = vmul.f32 %v425_v35, %v183_v34 }
 0x15f   :  { %426 = vlog2.f32 %v186_v36 }
 0x169   :  { %v427_v37 = vpop.eup %426 }
 0x16a   :  { %v188_v38 = vmul.f32 0.6931472, %v427_v37 }
 0x16c   :  { %v189_v39 = vmul.f32 0.5, %v188_v38 }
 0x16e   :  { %v190_v40 = vpack.c.bf16 %v189_v39, %v189_v39 }
 0x170   :  { %393 = vmatmul.mubr.bf16.vlgmr.msra.gmra.mrb[0].mxu1 %v190_v40 }
 0x243   :  { %v296_v42 = vpop.f32.mrb[0].mxu1 }
 0x244   :  { %v297_v43 = vadd.f32 %v329_v41, %v296_v42  ;;  %v394_v44 = vpop.f32.mrb[1].mxu1 }
 0x245   :  { %v299_v45 = vpop.f32.mrb[2].mxu1 }
 0x246   :  { %302 = vst [vmem:[#allocation8] sm:$0xff] %v297_v43  ;;  %v395_v46 = vpop.f32.mrb[3].mxu1 }
 0x247   :  { %505 = shalt.err (!%p502_p0)
}
 0x248   :  { %s506_s4 = scalar_lea.hbm %s625_s5, 128 }
 0x249   :  { %p507_p1 = scmp.ne.s32.totalorder %s625_s5, %s506_s4  ;;  %p510_p2 = scmp.lt.u32.totalorder %s506_s4, %s625_s5 }
 0x24b   :  { %p512_p3 = pnand %p510_p2, %p507_p1 }
 0x24d   :  { %515 = shalt.err (!%p512_p3)
}
 0x24e   :  { %312 = dma.vmem_to_hbm [thread:$0]  %s310_s7, 128, %s625_s5, [#allocation4]  }
 0x24f   :  { %520 = dma.done.wait [#allocation4], 128  }
 0x250   :  { %521 = vsyncadd [#allocation4], 4294967168 }
 0x251   :  { %316 = vsyncpa [#allocation3], 1 }
 0x252   :  { %317 = vsyncpa [#allocation6], 1 }
 0x253   :  { %318 = vsyncpa [#allocation4], 1 }

</bundles_post_ra>
